<compile_context>
chip_gen: v7x
topology: tpu7x:2x2x1
jax: 0.10.0
libtpu: 0.0.40
codegen_flags: <defaults>
</compile_context>

<pallas_src>
from typing import NamedTuple

import jax
import jax.numpy as jnp
from jax.experimental import pallas as pl
from jax.experimental.pallas import tpu as pltpu


def _round_up(x, m):
    return ((x + m - 1) // m) * m


def _elu(x):
    # nn.ELU(alpha=1.0): x if x > 0 else exp(x) - 1.
    # No minimum() guard: an inf in the untaken exp branch is discarded by where()
    # (saves one VPU op per element). ELU(0) == 0 keeps padded lanes exactly zero.
    return jnp.where(x > 0, x, jnp.exp(x) - 1.0)


class PackedParams(NamedTuple):
    vecs: jax.Array    # (rows_pad, Wout) f32: layer-0 weight rows, all biases
    hmats: jax.Array   # (L, Hh, Hh)         : hidden-layer weights (f32 or bf16)
    fmat: jax.Array    # (Hh, Wout)          : [wl | I_H | 0] fused final + passthrough
    H: int
    n_class: int
    Hh: int
    Wout: int


def simplenet_kernel(x_ref, vec_ref, hmat_ref, fmat_ref, out_ref):
    # vec_ref rows: 0,1 = layer-0 weight rows ; 2 = b0 ; 3..3+L-1 = hidden biases ;
    #               3+L = combined final bias ([bl || 0]).
    # hmat_ref    : L padded (Hh, Hh) hidden weights.
    # fmat_ref    : (Hh, Wout) = [wl | I_H | 0]  (fused logits + pre passthrough).
    L = hmat_ref.shape[0]
    Hh = hmat_ref.shape[1]
    wdt = hmat_ref.dtype

    # ---- layer 0 via VPU broadcast FMAs (avoids a K=2 MXU matmul) ----
    h = (x_ref[:, 0:1] * vec_ref[0:1, :Hh]
         + x_ref[:, 1:2] * vec_ref[1:2, :Hh]
         + vec_ref[2:3, :Hh])
    h = _elu(h)

    # ---- hidden layers (static unroll; fine while n_layer is small) ----
    for l in range(L):
        h = jnp.dot(h.astype(wdt), hmat_ref[l], preferred_element_type=jnp.float32)
        h = _elu(h + vec_ref[3 + l:4 + l, :Hh])

    # ---- fused final linear + pre-activation passthrough, one lane-dense store ----
    out_ref[...] = (
        jnp.dot(h.astype(wdt), fmat_ref[...], preferred_element_type=jnp.float32)
        + vec_ref[3 + L:4 + L, :])


def pack_params(params, n_class, weight_dtype=jnp.float32):
    """Pack (w0,b0,wh,bh,wl,bl) into lane-dense slabs. Call ONCE, reuse per forward."""
    w0, b0, wh, bh, wl, bl = params
    H = w0.shape[1]
    L = wh.shape[0]
    assert L >= 1, "kernel expects at least one hidden Linear(H,H) layer"

    Hh = _round_up(H, 128)              # hidden lane width (used by all hidden matmuls)
    Wout = _round_up(n_class + H, 128)  # fused [logits || pre] output width (>= Hh)

    n_vec = 3 + L + 1
    vecs = jnp.zeros((_round_up(n_vec, 8), Wout), jnp.float32)
    vecs = vecs.at[0, :H].set(w0[0])
    vecs = vecs.at[1, :H].set(w0[1])
    vecs = vecs.at[2, :H].set(b0[0])
    vecs = vecs.at[3:3 + L, :H].set(bh[:, 0, :])
    vecs = vecs.at[3 + L, :n_class].set(bl[0])

    hmats = jnp.zeros((L, Hh, Hh), jnp.float32)
    hmats = hmats.at[:, :H, :H].set(wh)

    fmat = jnp.zeros((Hh, Wout), jnp.float32)
    fmat = fmat.at[:H, :n_class].set(wl)                                       # logits cols
    fmat = fmat.at[:H, n_class:n_class + H].set(jnp.eye(H, dtype=jnp.float32)) # pre passthrough

    return PackedParams(vecs=vecs,
                        hmats=hmats.astype(weight_dtype),
                        fmat=fmat.astype(weight_dtype),
                        H=H, n_class=n_class, Hh=Hh, Wout=Wout)


def simplenet_forward(x, packed: PackedParams):
    """Whole MLP in one Pallas call; returns (logits, pre_logits_hidden)."""
    vecs, hmats, fmat = packed.vecs, packed.hmats, packed.fmat
    H, n_class, Wout = packed.H, packed.n_class, packed.Wout
    B = x.shape[0]

    # Batch tile: multiple of 8 sublanes, capped at 512 rows; force >= 2 tiles when
    # B > 16 so the "parallel" axis can land on both v7x TensorCores.
    BT_MAX = 512
    if B > 16:
        BT = min(_round_up((B + 1) // 2, 8), BT_MAX)
    else:
        BT = _round_up(max(B, 1), 8)
    B_pad = _round_up(B, BT)
    if B_pad != B:
        x = jnp.pad(x, ((0, B_pad - B), (0, 0)))

    # Constant index_maps -> single-buffer the resident parameter slabs.
    resident = pl.Buffered(1)

    # Explicit scoped-VMEM request: weights (single-buffered) + double-buffered
    # x/out tiles + headroom; clamps into [16 MiB, 64 MiB] so it is valid on all gens.
    needed = (vecs.nbytes + hmats.nbytes + fmat.nbytes
              + 2 * BT * (2 + Wout) * 4 + (1 << 20))
    vmem_limit = int(min(64 * 1024 * 1024, max(16 * 1024 * 1024, 2 * needed)))

    out = pl.pallas_call(
        simplenet_kernel,
        out_shape=jax.ShapeDtypeStruct((B_pad, Wout), jnp.float32),
        grid_spec=pltpu.PrefetchScalarGridSpec(
            num_scalar_prefetch=0,
            grid=(B_pad // BT,),
            in_specs=[
                pl.BlockSpec((BT, 2), lambda i: (i, 0)),                              # x tile
                pl.BlockSpec(vecs.shape, lambda i: (0, 0), pipeline_mode=resident),   # biases / layer-0 rows
                pl.BlockSpec(hmats.shape, lambda i: (0, 0, 0), pipeline_mode=resident),  # hidden weights
                pl.BlockSpec(fmat.shape, lambda i: (0, 0), pipeline_mode=resident),   # fused final matrix
            ],
            out_specs=pl.BlockSpec((BT, Wout), lambda i: (i, 0)),                     # [logits || pre || 0]
        ),
        compiler_params=pltpu.CompilerParams(
            dimension_semantics=("parallel",),      # shard batch tiles across v7x TCs
            vmem_limit_bytes=vmem_limit),
    )(x, vecs, hmats, fmat)

    logits = out[:B, :n_class]
    pre = out[:B, n_class:n_class + H]
    return logits, pre


def init_params(key, n_layer, n_hidden, n_class):
    """PyTorch-Linear-style init U(-1/sqrt(fan_in), 1/sqrt(fan_in)); weights stored [in,out]."""
    def uni(k, shape, fan_in):
        bound = 1.0 / jnp.sqrt(jnp.float32(fan_in))
        return jax.random.uniform(k, shape, jnp.float32, -bound, bound)

    keys = jax.random.split(key, 6)
    w0 = uni(keys[0], (2, n_hidden), 2)
    b0 = uni(keys[1], (1, n_hidden), 2)
    wh = uni(keys[2], (n_layer, n_hidden, n_hidden), n_hidden)
    bh = uni(keys[3], (n_layer, 1, n_hidden), n_hidden)
    wl = uni(keys[4], (n_hidden, n_class), n_hidden)
    bl = uni(keys[5], (1, n_class), n_hidden)
    return (w0, b0, wh, bh, wl, bl)


def reference_forward(x, params):
    """Pure-JAX reference of SimpleNet.forward (n_class == 2 path), exact f32 matmuls."""
    w0, b0, wh, bh, wl, bl = params
    hp = jax.lax.Precision.HIGHEST
    h = _elu(jnp.dot(x, w0, precision=hp) + b0)
    for l in range(wh.shape[0]):
        h = _elu(jnp.dot(h, wh[l], precision=hp) + bh[l])
    return jnp.dot(h, wl, precision=hp) + bl, h


if __name__ == "__main__":
    # SimpleNet(n_layer=2, n_hidden=32, n_class=2): 4 Linear layers total.
    n_layer, n_hidden, n_class = 2, 32, 2

    key = jax.random.PRNGKey(0)
    k_x, k_x2, k_p = jax.random.split(key, 3)
    params = init_params(k_p, n_layer, n_hidden, n_class)

    # Packing hoisted out of the per-call path (done once, reused across forwards).
    packed_f32 = pack_params(params, n_class, weight_dtype=jnp.float32)

    # --- f32 weights, tiny batch (single tile) ---
    x = jax.random.normal(k_x, (8, 2), jnp.float32)
    out, pre = jax.block_until_ready(simplenet_forward(x, packed_f32))
    ref_out, ref_pre = reference_forward(x, params)
    assert out.shape == (8, n_class) and pre.shape == (8, n_hidden)
    assert jnp.allclose(out, ref_out, atol=1e-3, rtol=1e-3)
    assert jnp.allclose(pre, ref_pre, atol=1e-3, rtol=1e-3)

    # --- f32 weights, batch that needs padding and >= 2 grid tiles ---
    x2 = jax.random.normal(k_x2, (40, 2), jnp.float32)
    out2, pre2 = jax.block_until_ready(simplenet_forward(x2, packed_f32))
    ref_out2, ref_pre2 = reference_forward(x2, params)
    assert out2.shape == (40, n_class) and pre2.shape == (40, n_hidden)
    assert jnp.allclose(out2, ref_out2, atol=1e-3, rtol=1e-3)
    assert jnp.allclose(pre2, ref_pre2, atol=1e-3, rtol=1e-3)

    # --- bf16 weight slabs (f32 MXU accumulation): 2-3x MXU, half the weight DMA ---
    packed_bf16 = pack_params(params, n_class, weight_dtype=jnp.bfloat16)
    out3, pre3 = jax.block_until_ready(simplenet_forward(x2, packed_bf16))
    assert jnp.allclose(out3, ref_out2, atol=3e-2, rtol=3e-2)
    assert jnp.allclose(pre3, ref_pre2, atol=3e-2, rtol=3e-2)

    print("KERNEL_OK")
</pallas_src>

<mosaic_0001>
module attributes {stable_mosaic.version = 11 : i64} {
  func.func @simplenet_kernel(%arg0: i32, %arg1: memref<8x2xf32, #tpu.memory_space<vmem>>, %arg2: memref<8x128xf32, #tpu.memory_space<vmem>>, %arg3: memref<2x128x128xf32, #tpu.memory_space<vmem>>, %arg4: memref<128x128xf32, #tpu.memory_space<vmem>>, %arg5: memref<8x128xf32, #tpu.memory_space<vmem>>) attributes {dimension_semantics = [#tpu.dimension_semantics<parallel>], iteration_bounds = array<i64: 1>, scalar_prefetch = 0 : i64, scratch_operands = 0 : i64, tpu.core_type = #tpu.core_type<tc>, window_params = [{transform_indices = @transform_0, window_bounds = array<i64: 8, 2>}, {pipeline_mode = #tpu.pipeline_mode<synchronous>, transform_indices = @transform_1, window_bounds = array<i64: 8, 128>}, {pipeline_mode = #tpu.pipeline_mode<synchronous>, transform_indices = @transform_2, window_bounds = array<i64: 2, 128, 128>}, {pipeline_mode = #tpu.pipeline_mode<synchronous>, transform_indices = @transform_3, window_bounds = array<i64: 128, 128>}, {transform_indices = @transform_4, window_bounds = array<i64: 8, 128>}]} {
    %c0 = arith.constant 0 : index
    %c0_0 = arith.constant 0 : index
    %0 = vector.load %arg1[%c0, %c0_0] : memref<8x2xf32, #tpu.memory_space<vmem>>, vector<8x1xf32>
    %c0_1 = arith.constant 0 : index
    %c0_2 = arith.constant 0 : index
    %1 = vector.load %arg2[%c0_1, %c0_2] : memref<8x128xf32, #tpu.memory_space<vmem>>, vector<1x128xf32>
    %2 = vector.broadcast %0 : vector<8x1xf32> to vector<8x128xf32>
    %3 = vector.broadcast %1 : vector<1x128xf32> to vector<8x128xf32>
    %4 = arith.mulf %2, %3 : vector<8x128xf32>
    %c0_3 = arith.constant 0 : index
    %c1 = arith.constant 1 : index
    %5 = vector.load %arg1[%c0_3, %c1] : memref<8x2xf32, #tpu.memory_space<vmem>>, vector<8x1xf32>
    %c1_4 = arith.constant 1 : index
    %c0_5 = arith.constant 0 : index
    %6 = vector.load %arg2[%c1_4, %c0_5] : memref<8x128xf32, #tpu.memory_space<vmem>>, vector<1x128xf32>
    %7 = vector.broadcast %5 : vector<8x1xf32> to vector<8x128xf32>
    %8 = vector.broadcast %6 : vector<1x128xf32> to vector<8x128xf32>
    %9 = arith.mulf %7, %8 : vector<8x128xf32>
    %10 = arith.addf %4, %9 : vector<8x128xf32>
    %c2 = arith.constant 2 : index
    %c0_6 = arith.constant 0 : index
    %11 = vector.load %arg2[%c2, %c0_6] : memref<8x128xf32, #tpu.memory_space<vmem>>, vector<1x128xf32>
    %12 = vector.broadcast %11 : vector<1x128xf32> to vector<8x128xf32>
    %13 = arith.addf %10, %12 : vector<8x128xf32>
    %cst = arith.constant 0.000000e+00 : f32
    %14 = vector.broadcast %cst : f32 to vector<8x128xf32>
    %15 = arith.cmpf ogt, %13, %14 : vector<8x128xf32>
    %16 = math.exp %13 : vector<8x128xf32>
    %cst_7 = arith.constant 1.000000e+00 : f32
    %17 = vector.broadcast %cst_7 : f32 to vector<8x128xf32>
    %18 = arith.subf %16, %17 : vector<8x128xf32>
    %19 = arith.select %15, %13, %18 : vector<8x128xi1>, vector<8x128xf32>
    %c0_8 = arith.constant 0 : index
    %c0_9 = arith.constant 0 : index
    %c0_10 = arith.constant 0 : index
    %20 = vector.load %arg3[%c0_8, %c0_9, %c0_10] : memref<2x128x128xf32, #tpu.memory_space<vmem>>, vector<1x128x128xf32>
    %21 = vector.shape_cast %20 : vector<1x128x128xf32> to vector<128x128xf32>
    %cst_11 = arith.constant dense<0.000000e+00> : vector<8x128xf32>
    %22 = tpu.matmul %19, %21, %cst_11 {dimension_numbers = #tpu.dot_dimension_numbers<[1], [0], [0], [1], [0, 0, 1, 1], [], []>} : vector<8x128xf32>, vector<128x128xf32>, vector<8x128xf32> -> vector<8x128xf32>
    %c3 = arith.constant 3 : index
    %c0_12 = arith.constant 0 : index
    %23 = vector.load %arg2[%c3, %c0_12] : memref<8x128xf32, #tpu.memory_space<vmem>>, vector<1x128xf32>
    %24 = vector.broadcast %23 : vector<1x128xf32> to vector<8x128xf32>
    %25 = arith.addf %22, %24 : vector<8x128xf32>
    %cst_13 = arith.constant 0.000000e+00 : f32
    %26 = vector.broadcast %cst_13 : f32 to vector<8x128xf32>
    %27 = arith.cmpf ogt, %25, %26 : vector<8x128xf32>
    %28 = math.exp %25 : vector<8x128xf32>
    %cst_14 = arith.constant 1.000000e+00 : f32
    %29 = vector.broadcast %cst_14 : f32 to vector<8x128xf32>
    %30 = arith.subf %28, %29 : vector<8x128xf32>
    %31 = arith.select %27, %25, %30 : vector<8x128xi1>, vector<8x128xf32>
    %c1_15 = arith.constant 1 : index
    %c0_16 = arith.constant 0 : index
    %c0_17 = arith.constant 0 : index
    %32 = vector.load %arg3[%c1_15, %c0_16, %c0_17] : memref<2x128x128xf32, #tpu.memory_space<vmem>>, vector<1x128x128xf32>
    %33 = vector.shape_cast %32 : vector<1x128x128xf32> to vector<128x128xf32>
    %cst_18 = arith.constant dense<0.000000e+00> : vector<8x128xf32>
    %34 = tpu.matmul %31, %33, %cst_18 {dimension_numbers = #tpu.dot_dimension_numbers<[1], [0], [0], [1], [0, 0, 1, 1], [], []>} : vector<8x128xf32>, vector<128x128xf32>, vector<8x128xf32> -> vector<8x128xf32>
    %c4 = arith.constant 4 : index
    %c0_19 = arith.constant 0 : index
    %35 = vector.load %arg2[%c4, %c0_19] : memref<8x128xf32, #tpu.memory_space<vmem>>, vector<1x128xf32>
    %36 = vector.broadcast %35 : vector<1x128xf32> to vector<8x128xf32>
    %37 = arith.addf %34, %36 : vector<8x128xf32>
    %cst_20 = arith.constant 0.000000e+00 : f32
    %38 = vector.broadcast %cst_20 : f32 to vector<8x128xf32>
    %39 = arith.cmpf ogt, %37, %38 : vector<8x128xf32>
    %40 = math.exp %37 : vector<8x128xf32>
    %cst_21 = arith.constant 1.000000e+00 : f32
    %41 = vector.broadcast %cst_21 : f32 to vector<8x128xf32>
    %42 = arith.subf %40, %41 : vector<8x128xf32>
    %43 = arith.select %39, %37, %42 : vector<8x128xi1>, vector<8x128xf32>
    %c0_22 = arith.constant 0 : index
    %c0_23 = arith.constant 0 : index
    %44 = vector.load %arg4[%c0_22, %c0_23] : memref<128x128xf32, #tpu.memory_space<vmem>>, vector<128x128xf32>
    %cst_24 = arith.constant dense<0.000000e+00> : vector<8x128xf32>
    %45 = tpu.matmul %43, %44, %cst_24 {dimension_numbers = #tpu.dot_dimension_numbers<[1], [0], [0], [1], [0, 0, 1, 1], [], []>} : vector<8x128xf32>, vector<128x128xf32>, vector<8x128xf32> -> vector<8x128xf32>
    %c5 = arith.constant 5 : index
    %c0_25 = arith.constant 0 : index
    %46 = vector.load %arg2[%c5, %c0_25] : memref<8x128xf32, #tpu.memory_space<vmem>>, vector<1x128xf32>
    %47 = vector.broadcast %46 : vector<1x128xf32> to vector<8x128xf32>
    %48 = arith.addf %45, %47 : vector<8x128xf32>
    %c0_26 = arith.constant 0 : index
    %c0_27 = arith.constant 0 : index
    %49 = vector.load %arg5[%c0_26, %c0_27] : memref<8x128xf32, #tpu.memory_space<vmem>>, vector<8x128xf32>
    tpu.vector_store %arg5[%c0_26, %c0_27], %48 {strides = array<i32>} : memref<8x128xf32, #tpu.memory_space<vmem>>, vector<8x128xf32>,
    return
  }
  func.func @transform_0(%arg0: i32) -> (i32, i32) {
    %c0_i32 = arith.constant 0 : i32
    %c0_i32_0 = arith.constant 0 : i32
    return %arg0, %c0_i32 : i32, i32
  }
  func.func @transform_1(%arg0: i32) -> (i32, i32) {
    %c0_i32 = arith.constant 0 : i32
    %c0_i32_0 = arith.constant 0 : i32
    %c0_i32_1 = arith.constant 0 : i32
    return %c0_i32, %c0_i32_0 : i32, i32
  }
  func.func @transform_2(%arg0: i32) -> (i32, i32, i32) {
    %c0_i32 = arith.constant 0 : i32
    %c0_i32_0 = arith.constant 0 : i32
    %c0_i32_1 = arith.constant 0 : i32
    %c0_i32_2 = arith.constant 0 : i32
    return %c0_i32, %c0_i32_0, %c0_i32_1 : i32, i32, i32
  }
  func.func @transform_3(%arg0: i32) -> (i32, i32) {
    %c0_i32 = arith.constant 0 : i32
    %c0_i32_0 = arith.constant 0 : i32
    %c0_i32_1 = arith.constant 0 : i32
    return %c0_i32, %c0_i32_0 : i32, i32
  }
  func.func @transform_4(%arg0: i32) -> (i32, i32) {
    %c0_i32 = arith.constant 0 : i32
    %c0_i32_0 = arith.constant 0 : i32
    return %arg0, %c0_i32 : i32, i32
  }
}

</mosaic_0001>

<bundles_post_ra>
// kernel: tpu_custom_call.1
= control target key start
LH: loop header
LB: loop body
LE: loop exit
PB: predicated region body
PF: predicated region fallthrough
CT: control target
= control target key end

     0   :  { %9 = vsyncpa [#allocation3], 0  ;;  %s827_s0 = inlined_call_operand.vmem [shape: f32[8,2], index: 0, kind: input, shape index: {}]   ;;  %s828_s1 = inlined_call_operand.vmem [shape: f32[8,128], index: 1, kind: input, shape index: {}]   ;;  %s829_s2 = inlined_call_operand.hbm [shape: f32[2,128,128], index: 2, kind: input, shape index: {}]   ;;  %s830_s3 = inlined_call_operand.hbm [shape: f32[128,128], index: 3, kind: input, shape index: {}]   ;;  %s831_s4 = inlined_call_operand.hbm [shape: f32[8,128], index: 4, kind: output, shape index: {}]  }
   0x1   :  { %10 = vsyncpa [#allocation6], 0 }
   0x2   :  { %11 = vsyncpa [#allocation4], 0  ;;  %s708_s15 = smov [#allocation2]   ;;  %s636_s19 = scalar_lea.hbm %s829_s2, 4096 }
   0x3   :  { %s21_s16 = sshll.u32 %s708_s15, 4  ;;  %p637_p0 = scmp.ne.s32.totalorder %s829_s2, %s636_s19  ;;  %s22_s16 = int_to_ptr.vmem [resolvable:$true] %s21_s16 }
   0x4   :  { %p640_p1 = scmp.lt.u32.totalorder %s636_s19, %s829_s2 }
   0x6   :  { %p642_p2 = pnand %p640_p1, %p637_p0 }
   0x8   :  { %645 = shalt.err (!%p642_p2)
}
   0x9   :  { %s646_s24 = scalar_lea.vmem %s22_s16, 4096  ;;  %p651_p4 = scmp.lt.s32.totalorder %s22_s16, %s22_s16 }
   0xa   :  { %p647_p3 = scmp.ne.s32.totalorder %s22_s16, %s646_s24  ;;  %p652_p5 = scmp.lt.s32.totalorder %s646_s24, %s646_s24 }
   0xc   :  { %p653_p6 = por %p652_p5, %p651_p4 }
   0xe   :  { %p654_p7 = pnand %p653_p6, %p647_p3 }
  0x10   :  { %657 = shalt.err (!%p654_p7)
}
  0x11   :  { %s709_s25 = smov 128   ;;  %s710_s26 = smov 8  }
  0x12   :  { %27 = dma.hbm_to_vmem [thread:$0]  %s829_s2, 4096, %s22_s16, [#allocation3], %s709_s25, %s709_s25, %s710_s26  }
  0x13   :  { %s711_s29 = smov [#allocation5]   ;;  %s658_s7 = scalar_lea.hbm %s830_s3, 2048 }
  0x14   :  { %s33_s30 = sshll.u32 %s711_s29, 4  ;;  %p659_p8 = scmp.ne.s32.totalorder %s830_s3, %s658_s7  ;;  %s34_s30 = int_to_ptr.vmem [resolvable:$true] %s33_s30 }
  0x15   :  { %p662_p9 = scmp.lt.u32.totalorder %s658_s7, %s830_s3 }
  0x17   :  { %p664_p10 = pnand %p662_p9, %p659_p8 }
  0x19   :  { %667 = shalt.err (!%p664_p10)
}
  0x1a   :  { %s668_s12 = scalar_lea.vmem %s34_s30, 2048  ;;  %p673_p12 = scmp.lt.s32.totalorder %s34_s30, %s34_s30 }
  0x1b   :  { %p669_p11 = scmp.ne.s32.totalorder %s34_s30, %s668_s12  ;;  %p674_p13 = scmp.lt.s32.totalorder %s668_s12, %s668_s12 }
  0x1d   :  { %p675_p0 = por %p674_p13, %p673_p12 }
  0x1f   :  { %p676_p1 = pnand %p675_p0, %p669_p11 }
  0x21   :  { %679 = shalt.err (!%p676_p1)
}
  0x22   :  { %39 = dma.hbm_to_vmem [thread:$0]  %s830_s3, 2048, %s34_s30, [#allocation6], %s709_s25, %s709_s25, %s710_s26  }
  0x23   :  { %702 = dma.done.wait [#allocation3], 4096  }
  0x24   :  { %703 = vsyncadd [#allocation3], 4294963200 }
  0x25   :  { %704 = dma.done.wait [#allocation6], 2048  }
  0x26   :  { %705 = vsyncadd [#allocation6], 4294965248  ;;  %v712_v0 = vmov 0   ;;  %v713_v1 = vmov 0.0|0.0   ;;  %v46_v2 = vld [vmem:[%s827_s0] sm:$0xff]  ;;  %v80_v3 = vld [vmem:[#allocation2] sm:$0xff] }
  0x27   :  { %628 = vset.pattern.permute.xlu0 %v712_v0  ;;  %546 = vmatprep.subr.bf16.mxu0 %v713_v1  ;;  %v81_v4 = vld [vmem:[#allocation2 + $0x8] sm:$0xff]  ;;  %v82_v6 = vld [vmem:[#allocation2 + $0x10] sm:$0xff]  ;;  %v83_v7 = vld [vmem:[#allocation2 + $0x18] sm:$0xff]  ;;  %v714_v11 = vmov 1   ;;  %vm715_vm0 = vmmov 0   ;;  %v716_v18 = vmov 0.0  }
  0x28   :  { %570 = vmatprep.subr.bf16.mxu1 %v713_v1  ;;  %50 = vperm.xlu0 %628, %v46_v2   ;;  %v547_v5 = vpack.c.bf16 %v81_v4, %v80_v3  ;;  %v550_v8 = vpack.c.bf16 %v83_v7, %v82_v6  ;;  %v84_v9 = vld [vmem:[#allocation2 + $0x20] sm:$0xff]  ;;  %v85_v10 = vld [vmem:[#allocation2 + $0x28] sm:$0xff]  ;;  %v86_v13 = vld [vmem:[#allocation2 + $0x30] sm:$0xff]  ;;  %s717_s26 = smov [#allocation7]  }
  0x29   :  { %v553_v12 = vpack.c.bf16 %v85_v10, %v84_v9  ;;  %v87_v14 = vld [vmem:[#allocation2 + $0x38] sm:$0xff]  ;;  %v88_v16 = vld [vmem:[#allocation2 + $0x40] sm:$0xff]  ;;  %v89_v17 = vld [vmem:[#allocation2 + $0x48] sm:$0xff]  ;;  %473 = vmatprep.mubr.msk.f32.mxu0 %vm715_vm0, %v716_v18  ;;  %508 = vmatprep.mubr.msk.f32.mxu1 %vm715_vm0, %v716_v18  ;;  %s371_s27 = sshll.u32 %s717_s26, 4  ;;  %s372_s27 = int_to_ptr.vmem [resolvable:$true] %s371_s27 }
  0x2a   :  { %548 = vmatpush3.bf16.msra.mxu0 %v547_v5  ;;  %v556_v15 = vpack.c.bf16 %v87_v14, %v86_v13  ;;  %v559_v19 = vpack.c.bf16 %v89_v17, %v88_v16  ;;  %v90_v20 = vld [vmem:[#allocation2 + $0x50] sm:$0xff]  ;;  %v91_v21 = vld [vmem:[#allocation2 + $0x58] sm:$0xff]  ;;  %v92_v23 = vld [vmem:[#allocation2 + $0x60] sm:$0xff]  ;;  %s680_s28 = scalar_lea.vmem %s372_s27, 128  ;;  %p685_p3 = scmp.lt.s32.totalorder %s372_s27, %s372_s27 }
  0x2b   :  { %549 = vmatprep.subr.bf16.mxu0 %v713_v1  ;;  %v562_v22 = vpack.c.bf16 %v91_v21, %v90_v20  ;;  %v93_v24 = vld [vmem:[#allocation2 + $0x68] sm:$0xff]  ;;  %v94_v26 = vld [vmem:[#allocation2 + $0x70] sm:$0xff]  ;;  %v95_v27 = vld [vmem:[#allocation2 + $0x78] sm:$0xff]  ;;  %p681_p2 = scmp.ne.s32.totalorder %s372_s27, %s680_s28  ;;  %p686_p4 = scmp.lt.s32.totalorder %s680_s28, %s680_s28 }
  0x2c   :  { %629 = vset.pattern.permute.xlu0 %v714_v11  ;;  %v565_v25 = vpack.c.bf16 %v93_v24, %v92_v23  ;;  %v568_v28 = vpack.c.bf16 %v95_v27, %v94_v26  ;;  %v177_v29 = vld [vmem:[#allocation2 + $0x80] sm:$0xff]  ;;  %v178_v30 = vld [vmem:[#allocation2 + $0x88] sm:$0xff]  ;;  %v179_v31 = vld [vmem:[#allocation2 + $0x90] sm:$0xff] }
  0x2d   :  { %60 = vperm.xlu0 %629, %v46_v2   ;;  %v571_v32 = vpack.c.bf16 %v178_v30, %v177_v29  ;;  %v180_v33 = vld [vmem:[#allocation2 + $0x98] sm:$0xff]  ;;  %v181_v35 = vld [vmem:[#allocation2 + $0xa0] sm:$0xff]  ;;  %v182_v36 = vld [vmem:[#allocation2 + $0xa8] sm:$0xff]  ;;  %p687_p5 = por %p686_p4, %p685_p3 }
  0x2e   :  { %551 = vmatpush3.bf16.msra.mxu0 %v550_v8  ;;  %v574_v34 = vpack.c.bf16 %v180_v33, %v179_v31  ;;  %v577_v37 = vpack.c.bf16 %v182_v36, %v181_v35  ;;  %v381_v39 = vld [vmem:[%s828_s1] ss:$0 sm:$0xff]  ;;  %v382_v40 = vld [vmem:[%s828_s1 + $0x1] ss:$0 sm:$0xff]  ;;  %v383_v44 = vld [vmem:[%s828_s1 + $0x2] ss:$0 sm:$0xff] }
  0x2f   :  { %552 = vmatprep.subr.bf16.mxu0 %v713_v1  ;;  %572 = vmatpush3.bf16.msra.mxu1 %v571_v32  ;;  %v183_v51 = vld [vmem:[#allocation2 + $0xb0] sm:$0xff]  ;;  %v184_v52 = vld [vmem:[#allocation2 + $0xb8] sm:$0xff]  ;;  %v185_v54 = vld [vmem:[#allocation2 + $0xc0] sm:$0xff]  ;;  %p688_p6 = pnand %p687_p5, %p681_p2 }
  0x30   :  { %573 = vmatprep.subr.bf16.mxu1 %v713_v1  ;;  %v580_v53 = vpack.c.bf16 %v184_v52, %v183_v51  ;;  %v186_v55 = vld [vmem:[#allocation2 + $0xc8] sm:$0xff]  ;;  %v187_v57 = vld [vmem:[#allocation2 + $0xd0] sm:$0xff]  ;;  %v188_v58 = vld [vmem:[#allocation2 + $0xd8] sm:$0xff] }
  0x31   :  { %v583_v56 = vpack.c.bf16 %v186_v55, %v185_v54  ;;  %v189_v59 = vld [vmem:[#allocation2 + $0xe0] sm:$0xff]  ;;  %v586_v60 = vpack.c.bf16 %v188_v58, %v187_v57  ;;  %v190_v61 = vld [vmem:[#allocation2 + $0xe8] sm:$0xff]  ;;  %v191_v63 = vld [vmem:[#allocation2 + $0xf0] sm:$0xff] }
  0x32   :  { %554 = vmatpush3.bf16.msra.mxu0 %v553_v12  ;;  %v589_v62 = vpack.c.bf16 %v190_v61, %v189_v59  ;;  %v192_v0 = vld [vmem:[#allocation2 + $0xf8] sm:$0xff]  ;;  %v273_v3 = vld [vmem:[#allocation5] sm:$0xff]  ;;  %v274_v4 = vld [vmem:[#allocation5 + $0x8] sm:$0xff] }
  0x33   :  { %555 = vmatprep.subr.bf16.mxu0 %v713_v1  ;;  %575 = vmatpush3.bf16.msra.mxu1 %v574_v34  ;;  %v592_v2 = vpack.c.bf16 %v192_v0, %v191_v63  ;;  %v275_v5 = vld [vmem:[#allocation5 + $0x10] sm:$0xff]  ;;  %v595_v6 = vpack.c.bf16 %v274_v4, %v273_v3  ;;  %v276_v7 = vld [vmem:[#allocation5 + $0x18] sm:$0xff]  ;;  %v277_v9 = vld [vmem:[#allocation5 + $0x20] sm:$0xff] }
  0x34   :  { %576 = vmatprep.subr.bf16.mxu1 %v713_v1  ;;  %v598_v8 = vpack.c.bf16 %v276_v7, %v275_v5  ;;  %v278_v10 = vld [vmem:[#allocation5 + $0x28] sm:$0xff]  ;;  %v385_v12 = vld [vmem:[%s828_s1 + $0x3] ss:$0 sm:$0xff]  ;;  %v280_v21 = vld [vmem:[#allocation5 + $0x38] sm:$0xff] }
  0x35   :  { %v601_v11 = vpack.c.bf16 %v278_v10, %v277_v9  ;;  %v279_v20 = vld [vmem:[#allocation5 + $0x30] sm:$0xff]  ;;  %v281_v23 = vld [vmem:[#allocation5 + $0x40] sm:$0xff]  ;;  %v282_v24 = vld [vmem:[#allocation5 + $0x48] sm:$0xff] }
  0x36   :  { %557 = vmatpush3.bf16.msra.mxu0 %v556_v15  ;;  %v283_v26 = vld [vmem:[#allocation5 + $0x50] sm:$0xff]  ;;  %v284_v27 = vld [vmem:[#allocation5 + $0x58] sm:$0xff]  ;;  %v286_v30 = vld [vmem:[#allocation5 + $0x68] sm:$0xff] }
  0x37   :  { %558 = vmatprep.subr.bf16.mxu0 %v713_v1  ;;  %578 = vmatpush3.bf16.msra.mxu1 %v577_v37  ;;  %v610_v29 = vpack.c.bf16 %v284_v27, %v283_v26  ;;  %v287_v32 = vld [vmem:[#allocation5 + $0x70] sm:$0xff]  ;;  %v288_v33 = vld [vmem:[#allocation5 + $0x78] sm:$0xff] }
  0x38   :  { %579 = vmatprep.subr.bf16.mxu1 %v713_v1  ;;  %v616_v34 = vpack.c.bf16 %v288_v33, %v287_v32  ;;  %v387_v35 = vld [vmem:[%s828_s1 + $0x4] ss:$0 sm:$0xff] }
  0x3a   :  { %560 = vmatpush3.bf16.msra.mxu0 %v559_v19 }
  0x3b   :  { %561 = vmatprep.subr.bf16.mxu0 %v713_v1  ;;  %581 = vmatpush3.bf16.msra.mxu1 %v580_v53 }
  0x3c   :  { %582 = vmatprep.subr.bf16.mxu1 %v713_v1 }
  0x3e   :  { %563 = vmatpush3.bf16.msra.mxu0 %v562_v22  ;;  %v604_v22 = vpack.c.bf16 %v280_v21, %v279_v20 }
  0x3f   :  { %564 = vmatprep.subr.bf16.mxu0 %v713_v1  ;;  %584 = vmatpush3.bf16.msra.mxu1 %v583_v56 }
  0x40   :  { %585 = vmatprep.subr.bf16.mxu1 %v713_v1 }
  0x42   :  { %566 = vmatpush3.bf16.msra.mxu0 %v565_v25  ;;  %v607_v25 = vpack.c.bf16 %v282_v24, %v281_v23 }
  0x43   :  { %567 = vmatprep.subr.bf16.mxu0 %v713_v1  ;;  %587 = vmatpush3.bf16.msra.mxu1 %v586_v60 }
  0x44   :  { %588 = vmatprep.subr.bf16.mxu1 %v713_v1 }
  0x46   :  { %569 = vmatpush3.bf16.msra.mxu0 %v568_v28  ;;  %v285_v28 = vld [vmem:[#allocation5 + $0x60] sm:$0xff] }
  0x47   :  { %594 = vmatprep.subr.bf16.mxu0 %v713_v1  ;;  %590 = vmatpush3.bf16.msra.mxu1 %v589_v62  ;;  %v613_v31 = vpack.c.bf16 %v286_v30, %v285_v28 }
  0x48   :  { %591 = vmatprep.subr.bf16.mxu1 %v713_v1 }
  0x4b   :  { %593 = vmatpush3.bf16.msra.mxu1 %v592_v2 }
  0xa7   :  { %v51_v38 = vpop.permute.xlu0 %50 }
  0xa8   :  { %v57_v42 = vmul.f32 %v381_v39, %v51_v38 }
  0xac   :  { %v61_v41 = vpop.permute.xlu0 %60 }
  0xad   :  { %v67_v43 = vmul.f32 %v382_v40, %v61_v41 }
  0xaf   :  { %v68_v45 = vadd.f32 %v67_v43, %v57_v42  ;;  %v389_v43 = vld [vmem:[%s828_s1 + $0x5] ss:$0 sm:$0xff] }
  0xb1   :  { %v74_v46 = vadd.f32 %v383_v44, %v68_v45 }
  0xb3   :  { %v76_v47 = vmul.f32 1.442695, %v74_v46  ;;  %vm75_vm1 = vcmp.gt.f32.partialorder %v74_v46, 0.0 }
  0xb5   :  { %630 = vpow2.f32 %v76_v47 }
  0xbf   :  { %v631_v48 = vpop.eup %630 }
  0xc0   :  { %v384_v49 = vadd.f32 -1.0, %v631_v48 }
  0xc2   :  { %v79_v50 = vsel %vm75_vm1, %v74_v46, %v384_v49 }
  0xc3   :  { %474 = vmatmul.mubr.f32.vlgmr.msra.gmra.mrb[0].mxu0 %v79_v50 }
  0xc4   :  { %543 = vmatprep.mubr.msk.f32.mxu0 %vm715_vm0, %v716_v18  ;;  %596 = vmatpush3.bf16.msra.mxu0 %v595_v6 }
  0xc5   :  { %597 = vmatprep.subr.bf16.mxu0 %v713_v1 }
  0xc8   :  { %599 = vmatpush3.bf16.msra.mxu0 %v598_v8 }
  0xc9   :  { %600 = vmatprep.subr.bf16.mxu0 %v713_v1 }
  0xcc   :  { %602 = vmatpush3.bf16.msra.mxu0 %v601_v11 }
  0xcd   :  { %603 = vmatprep.subr.bf16.mxu0 %v713_v1 }
  0xd0   :  { %605 = vmatpush3.bf16.msra.mxu0 %v604_v22 }
  0xd1   :  { %606 = vmatprep.subr.bf16.mxu0 %v713_v1 }
  0xd4   :  { %608 = vmatpush3.bf16.msra.mxu0 %v607_v25 }
  0xd5   :  { %609 = vmatprep.subr.bf16.mxu0 %v713_v1 }
  0xd8   :  { %611 = vmatpush3.bf16.msra.mxu0 %v610_v29 }
  0xd9   :  { %612 = vmatprep.subr.bf16.mxu0 %v713_v1 }
  0xdc   :  { %614 = vmatpush3.bf16.msra.mxu0 %v613_v31 }
  0xdd   :  { %615 = vmatprep.subr.bf16.mxu0 %v713_v1 }
  0xe0   :  { %617 = vmatpush3.bf16.msra.mxu0 %v616_v34 }
 0x196   :  { %v167_v13 = vpop.f32.mrb[0].mxu0 }
 0x197   :  { %v168_v14 = vadd.f32 %v385_v12, %v167_v13  ;;  %v475_v15 = vpop.f32.mrb[1].mxu0 }
 0x199   :  { %v172_v16 = vmul.f32 1.442695, %v168_v14  ;;  %vm171_vm2 = vcmp.gt.f32.partialorder %v168_v14, 0.0 }
 0x19b   :  { %632 = vpow2.f32 %v172_v16 }
 0x1a5   :  { %v633_v17 = vpop.eup %632 }
 0x1a6   :  { %v386_v18 = vadd.f32 -1.0, %v633_v17 }
 0x1a8   :  { %v175_v19 = vsel %vm171_vm2, %v168_v14, %v386_v18 }
 0x1a9   :  { %509 = vmatmul.mubr.f32.vlgmr.msra.gmra.mrb[0].mxu1 %v175_v19 }
 0x27c   :  { %v264_v36 = vpop.f32.mrb[0].mxu1 }
 0x27d   :  { %v265_v37 = vadd.f32 %v387_v35, %v264_v36  ;;  %v510_v38 = vpop.f32.mrb[1].mxu1 }
 0x27f   :  { %v269_v39 = vmul.f32 1.442695, %v265_v37  ;;  %vm268_vm3 = vcmp.gt.f32.partialorder %v265_v37, 0.0 }
 0x281   :  { %634 = vpow2.f32 %v269_v39 }
 0x28b   :  { %v635_v40 = vpop.eup %634 }
 0x28c   :  { %v388_v41 = vadd.f32 -1.0, %v635_v40 }
 0x28e   :  { %v272_v42 = vsel %vm268_vm3, %v265_v37, %v388_v41 }
 0x28f   :  { %544 = vmatmul.mubr.f32.vlgmr.msra.gmra.mrb[2].mxu0 %v272_v42 }
 0x362   :  { %v360_v1 = vpop.f32.mrb[2].mxu0 }
 0x363   :  { %v361_v44 = vadd.f32 %v389_v43, %v360_v1  ;;  %v545_v45 = vpop.f32.mrb[3].mxu0 }
 0x365   :  { %364 = vst [vmem:[#allocation7] sm:$0xff] %v361_v44 }
 0x366   :  { %691 = shalt.err (!%p688_p6)
}
 0x367   :  { %s692_s5 = scalar_lea.hbm %s831_s4, 128 }
 0x368   :  { %p693_p7 = scmp.ne.s32.totalorder %s831_s4, %s692_s5  ;;  %p696_p8 = scmp.lt.u32.totalorder %s692_s5, %s831_s4 }
 0x36a   :  { %p698_p9 = pnand %p696_p8, %p693_p7 }
 0x36c   :  { %701 = shalt.err (!%p698_p9)
}
 0x36d   :  { %374 = dma.vmem_to_hbm [thread:$0]  %s372_s27, 128, %s831_s4, [#allocation4]  }
 0x36e   :  { %706 = dma.done.wait [#allocation4], 128  }
 0x36f   :  { %707 = vsyncadd [#allocation4], 4294967168 }
 0x370   :  { %378 = vsyncpa [#allocation3], 1 }
 0x371   :  { %379 = vsyncpa [#allocation6], 1 }
 0x372   :  { %380 = vsyncpa [#allocation4], 1 }

</bundles_post_ra>
